<compile_context>
chip_gen: v5e
topology: v5e:2x2
jax: 0.10.0
libtpu: 0.0.40
codegen_flags: <defaults>
</compile_context>

<pallas_src>
import functools

import jax
import jax.numpy as jnp
from jax import lax
from jax.experimental import pallas as pl
from jax.experimental.pallas import tpu as pltpu


def _round_up(v, m):
    return (v + m - 1) // m * m


# ==========================================================================
# Small-N path: everything fused in one kernel (no grid).
# ==========================================================================
def _fused_kernel(x_ref, w_enc_ref, b_enc_ref, w_gat_ref, a_ref,
                  h_ref, gat_ref, *, n_valid):
    # encoder: tanh(x @ W_enc + b)   (bf16 MXU operands, f32 accumulate)
    h = jnp.tanh(
        jnp.dot(x_ref[...], w_enc_ref[...], preferred_element_type=jnp.float32)
        + b_enc_ref[...]
    )
    h_ref[...] = h.astype(h_ref.dtype)

    # GAT linear projection
    wh = jnp.dot(h.astype(jnp.bfloat16), w_gat_ref[...],
                 preferred_element_type=jnp.float32)

    # attention scores (VPU row-reductions)
    s = jnp.sum(wh * a_ref[0:1, :], axis=-1, keepdims=True)      # (Np, 1)
    t_col = jnp.sum(wh * a_ref[1:2, :], axis=-1, keepdims=True)  # (Np, 1)

    n = h_ref.shape[0]
    node = lax.broadcasted_iota(jnp.int32, (1, n), 1)
    t_row = jnp.where(node < n_valid, t_col.T, -1e30)             # (1, Np)

    # e_ij = LeakyReLU(s_i + t_j), softmax over j, out = alpha @ Wh
    e = s + t_row
    e = jnp.where(e > 0, e, 0.2 * e)
    m = jnp.max(e, axis=-1, keepdims=True)
    p = jnp.exp(e - m)
    l = jnp.sum(p, axis=-1, keepdims=True)
    acc = jnp.dot(p.astype(jnp.bfloat16), wh.astype(jnp.bfloat16),
                  preferred_element_type=jnp.float32)
    gat_ref[...] = acc * pl.reciprocal(l, approx=True)


# ==========================================================================
# Large-N path, stage 1: encoder + projection + scores (row tiles)
# ==========================================================================
def _encode_kernel(x_ref, w_enc_ref, b_enc_ref, w_gat_ref, a_ref,
                   h_ref, wh_ref, s_ref, t_ref, *, n_valid):
    i = pl.program_id(0)
    tr = h_ref.shape[0]

    h = jnp.tanh(
        jnp.dot(x_ref[...], w_enc_ref[...], preferred_element_type=jnp.float32)
        + b_enc_ref[...]
    )
    h_ref[...] = h.astype(h_ref.dtype)

    wh = jnp.dot(h.astype(jnp.bfloat16), w_gat_ref[...],
                 preferred_element_type=jnp.float32)
    wh_ref[...] = wh.astype(wh_ref.dtype)

    # s_i = Wh_i . a_src (column);  t_j = Wh_j . a_dst (lane-dense row, masked)
    s_ref[...] = jnp.sum(wh * a_ref[0:1, :], axis=-1, keepdims=True)
    t_col = jnp.sum(wh * a_ref[1:2, :], axis=-1, keepdims=True)
    t_row = t_col.T                                                # (1, tr)
    node = i * tr + lax.broadcasted_iota(jnp.int32, t_row.shape, 1)
    t_ref[...] = jnp.where(node < n_valid, t_row, -1e30)


# ==========================================================================
# Large-N path, stage 2: online-softmax GAT attention, rank-1 factorized exp
# ==========================================================================
def _gat_attn_kernel(s_ref, t_ref, wh_ref, out_ref, m_ref, l_ref,
                     *, tk, wh_resident):
    ki = pl.program_id(1)

    @pl.when(ki == 0)
    def _():
        m_ref[...] = jnp.full_like(m_ref, -jnp.inf)
        l_ref[...] = jnp.zeros_like(l_ref)
        out_ref[...] = jnp.zeros_like(out_ref)

    s_col = s_ref[...]                                   # (tq, 1)  f32
    t_row = t_ref[...]                                   # (1, tk)  f32 (padded = -1e30)

    # rank-1 structure:  exp(LeakyReLU(s_i+t_j) - m) =
    #   where(s_i+t_j>0, exp(s_i+T-m)*exp(t_j-T), exp(0.2*(s_i+T)-m)*exp(0.2*(t_j-T)))
    # -> only O(tq+tk) EUP work per step; inner loop is pure VPU.
    T = jnp.max(t_row, axis=-1, keepdims=True)           # (1, 1) tile max of t
    srt = s_col + T                                      # (tq, 1)
    e_max = jnp.where(srt > 0, srt, 0.2 * srt)           # max_j e_ij per row

    m_prev = m_ref[...]
    m_new = jnp.maximum(m_prev, e_max)
    corr = jnp.exp(m_prev - m_new)

    fp = jnp.exp(srt - m_new)                            # (tq, 1)
    fn = jnp.exp(0.2 * srt - m_new)                      # (tq, 1)
    etp = jnp.exp(t_row - T)                             # (1, tk)
    etn = jnp.exp(0.2 * (t_row - T))                     # (1, tk)

    pos = (s_col + t_row) > 0                            # (tq, tk)
    p = jnp.where(pos, fp * etp, fn * etn)               # (tq, tk)

    l_ref[...] = corr * l_ref[...] + jnp.sum(p, axis=-1, keepdims=True)

    if wh_resident:
        k0 = pl.multiple_of(ki * tk, tk)
        wh_tile = wh_ref[pl.ds(k0, tk), :]
    else:
        wh_tile = wh_ref[...]
    out_ref[...] = corr * out_ref[...] + jnp.dot(
        p.astype(jnp.bfloat16), wh_tile, preferred_element_type=jnp.float32)
    m_ref[...] = m_new

    @pl.when(ki == pl.num_programs(1) - 1)
    def _():
        out_ref[...] = out_ref[...] * pl.reciprocal(l_ref[...], approx=True)


# ==========================================================================
# Wrappers
# ==========================================================================
def _choose_tiles(n):
    """Padding granularity 256; tiles up to 512; >=2 parallel tiles when possible."""
    n_pad = _round_up(n, 256)

    def _tile():
        if n_pad % 512 == 0 and n_pad // 512 >= 2:
            return 512
        if n_pad // 256 >= 2:
            return 256
        return n_pad

    tr = _tile()                                   # stage-1 row tile
    tq = _tile()                                   # stage-2 query tile
    tk = 512 if n_pad % 512 == 0 else 256          # stage-2 kv tile (divides n_pad)
    return n_pad, tr, tq, tk


def _small_fused(x, w_enc_p, b_enc_p, w_gat_p, a_pack, N, F, H, H_pad):
    f32, bf16 = jnp.float32, jnp.bfloat16
    N_pad = _round_up(N, 8)
    x_p = jnp.zeros((N_pad, F), bf16).at[:N, :].set(x.astype(bf16))

    h_pad, gat_pad = pl.pallas_call(
        functools.partial(_fused_kernel, n_valid=N),
        out_shape=(
            jax.ShapeDtypeStruct((N_pad, H_pad), bf16),
            jax.ShapeDtypeStruct((N_pad, H_pad), f32),
        ),
        compiler_params=pltpu.CompilerParams(vmem_limit_bytes=32 * 1024 * 1024),
    )(x_p, w_enc_p, b_enc_p, w_gat_p, a_pack)

    return h_pad[:N, :H].astype(f32), gat_pad[:N, :H]


def _two_stage(x, w_enc_p, b_enc_p, w_gat_p, a_pack, N, F, H, H_pad):
    f32, bf16 = jnp.float32, jnp.bfloat16
    N_pad, tr, tq, tk = _choose_tiles(N)
    x_p = jnp.zeros((N_pad, F), bf16).at[:N, :].set(x.astype(bf16))

    n_row = N_pad // tr

    # ---- stage 1: encoder + projection + scores -------------------------
    h_pad, wh_pad, s_col, t_row = pl.pallas_call(
        functools.partial(_encode_kernel, n_valid=N),
        out_shape=(
            jax.ShapeDtypeStruct((N_pad, H_pad), bf16),   # encoder output
            jax.ShapeDtypeStruct((N_pad, H_pad), bf16),   # Wh
            jax.ShapeDtypeStruct((N_pad, 1), f32),        # s_i (column)
            jax.ShapeDtypeStruct((1, N_pad), f32),        # t_j (row, masked)
        ),
        grid_spec=pltpu.PrefetchScalarGridSpec(
            num_scalar_prefetch=0,
            grid=(n_row,),
            in_specs=[
                pl.BlockSpec((tr, F), lambda i: (i, 0)),
                pl.BlockSpec((F, H_pad), lambda i: (0, 0)),
                pl.BlockSpec((1, H_pad), lambda i: (0, 0)),
                pl.BlockSpec((H_pad, H_pad), lambda i: (0, 0)),
                pl.BlockSpec((2, H_pad), lambda i: (0, 0)),
            ],
            out_specs=[
                pl.BlockSpec((tr, H_pad), lambda i: (i, 0)),
                pl.BlockSpec((tr, H_pad), lambda i: (i, 0)),
                pl.BlockSpec((tr, 1), lambda i: (i, 0)),
                pl.BlockSpec((1, tr), lambda i: (0, i)),
            ],
        ),
        compiler_params=pltpu.CompilerParams(
            dimension_semantics=("parallel",),
        ),
    )(x_p, w_enc_p, b_enc_p, w_gat_p, a_pack)

    # ---- stage 2: GAT attention, online softmax over kv tiles -----------
    n_q = N_pad // tq
    n_kv = N_pad // tk
    wh_bytes = N_pad * H_pad * 2
    wh_resident = wh_bytes <= 12 * 1024 * 1024
    if wh_resident:
        wh_spec = pl.BlockSpec((N_pad, H_pad), lambda qi, ki: (0, 0))
        vmem_limit = min(48 * 1024 * 1024,
                         2 * wh_bytes + 2 * tq * H_pad * 4 + 8 * 1024 * 1024)
    else:
        wh_spec = pl.BlockSpec((tk, H_pad), lambda qi, ki: (ki, 0))
        vmem_limit = 32 * 1024 * 1024

    gat_pad = pl.pallas_call(
        functools.partial(_gat_attn_kernel, tk=tk, wh_resident=wh_resident),
        out_shape=jax.ShapeDtypeStruct((N_pad, H_pad), f32),
        grid_spec=pltpu.PrefetchScalarGridSpec(
            num_scalar_prefetch=0,
            grid=(n_q, n_kv),
            in_specs=[
                pl.BlockSpec((tq, 1), lambda qi, ki: (qi, 0)),   # s (query col)
                pl.BlockSpec((1, tk), lambda qi, ki: (0, ki)),   # t (kv row)
                wh_spec,                                         # Wh
            ],
            out_specs=pl.BlockSpec((tq, H_pad), lambda qi, ki: (qi, 0)),
            scratch_shapes=[
                pltpu.VMEM((tq, 1), f32),   # running max
                pltpu.VMEM((tq, 1), f32),   # running denom
            ],
        ),
        compiler_params=pltpu.CompilerParams(
            dimension_semantics=("parallel", "arbitrary"),
            vmem_limit_bytes=vmem_limit,
        ),
    )(s_col, t_row, wh_pad)

    return h_pad[:N, :H].astype(f32), gat_pad[:N, :H]


def graph_prod2vec(x, w_enc, b_enc, w_gat, a_src, a_dst, *, force_two_stage=False):
    N, F = x.shape
    H = w_enc.shape[1]
    f32, bf16 = jnp.float32, jnp.bfloat16

    # lane-pad the H axis only (zero pad).  F and N are not inflated in HBM.
    H_pad = _round_up(H, 128)
    w_enc_p = jnp.zeros((F, H_pad), bf16).at[:, :H].set(w_enc.astype(bf16))
    b_enc_p = jnp.zeros((1, H_pad), f32).at[:, :H].set(
        b_enc.reshape(1, -1).astype(f32))
    w_gat_p = jnp.zeros((H_pad, H_pad), bf16).at[:H, :H].set(w_gat.astype(bf16))
    a_pack = jnp.zeros((2, H_pad), f32)
    a_pack = a_pack.at[0, :H].set(a_src.reshape(-1).astype(f32))
    a_pack = a_pack.at[1, :H].set(a_dst.reshape(-1).astype(f32))

    if (not force_two_stage) and N <= 512:
        return _small_fused(x, w_enc_p, b_enc_p, w_gat_p, a_pack, N, F, H, H_pad)
    return _two_stage(x, w_enc_p, b_enc_p, w_gat_p, a_pack, N, F, H, H_pad)


def init_params(key, f_in, hidden):
    k1, k2, k3, k4 = jax.random.split(key, 4)
    w_enc = jax.random.normal(k1, (f_in, hidden), jnp.float32) * 0.1
    b_enc = jnp.zeros((1, hidden), jnp.float32)
    w_gat = jax.random.normal(k2, (hidden, hidden), jnp.float32) * 0.1
    a_src = jax.random.normal(k3, (hidden, 1), jnp.float32) * 0.1
    a_dst = jax.random.normal(k4, (hidden, 1), jnp.float32) * 0.1
    return w_enc, b_enc, w_gat, a_src, a_dst


if __name__ == "__main__":
    key = jax.random.PRNGKey(0)
    k_x, k_p = jax.random.split(key)

    N, F, H = 50, 10, 32            # matches `torch.rand(50, 10)` in the template
    x = jax.random.uniform(k_x, (N, F), jnp.float32)
    w_enc, b_enc, w_gat, a_src, a_dst = init_params(k_p, F, H)

    # pure-JAX f32 reference (kernel uses bf16 MXU operands -> looser tolerance)
    h_ref = jnp.tanh(x @ w_enc + b_enc)
    wh_ref = h_ref @ w_gat
    e_ref = wh_ref @ a_src + (wh_ref @ a_dst).T
    e_ref = jnp.where(e_ref > 0, e_ref, 0.2 * e_ref)
    alpha_ref = jax.nn.softmax(e_ref, axis=-1)
    gat_ref = alpha_ref @ wh_ref

    # fused small-N path (what the shipped shape exercises)
    enc_out, gat_out = graph_prod2vec(x, w_enc, b_enc, w_gat, a_src, a_dst)
    jax.block_until_ready((enc_out, gat_out))
    assert enc_out.shape == (N, H) and gat_out.shape == (N, H)
    assert jnp.allclose(enc_out, h_ref, atol=2e-2, rtol=2e-2), "encoder mismatch"
    assert jnp.allclose(gat_out, gat_ref, atol=2e-2, rtol=2e-2), "GAT mismatch"

    # also exercise the tiled two-stage (large-N) path on the same data
    enc2, gat2 = graph_prod2vec(x, w_enc, b_enc, w_gat, a_src, a_dst,
                                force_two_stage=True)
    jax.block_until_ready((enc2, gat2))
    assert jnp.allclose(enc2, h_ref, atol=2e-2, rtol=2e-2), "encoder mismatch (2-stage)"
    assert jnp.allclose(gat2, gat_ref, atol=2e-2, rtol=2e-2), "GAT mismatch (2-stage)"

    print("KERNEL_OK")
</pallas_src>

<mosaic_0001>
module attributes {stable_mosaic.version = 11 : i64} {
  func.func @_fused_kernel(%arg0: memref<56x10xbf16, #tpu.memory_space<vmem>>, %arg1: memref<10x128xbf16, #tpu.memory_space<vmem>>, %arg2: memref<1x128xf32, #tpu.memory_space<vmem>>, %arg3: memref<128x128xbf16, #tpu.memory_space<vmem>>, %arg4: memref<2x128xf32, #tpu.memory_space<vmem>>, %arg5: memref<56x128xbf16, #tpu.memory_space<vmem>>, %arg6: memref<56x128xf32, #tpu.memory_space<vmem>>) attributes {dimension_semantics = [], scalar_prefetch = 0 : i64, scratch_operands = 0 : i64, tpu.core_type = #tpu.core_type<tc>} {
    %c0 = arith.constant 0 : index
    %c0_0 = arith.constant 0 : index
    %0 = vector.load %arg0[%c0, %c0_0] : memref<56x10xbf16, #tpu.memory_space<vmem>>, vector<56x10xbf16>
    %c0_1 = arith.constant 0 : index
    %c0_2 = arith.constant 0 : index
    %1 = vector.load %arg1[%c0_1, %c0_2] : memref<10x128xbf16, #tpu.memory_space<vmem>>, vector<10x128xbf16>
    %cst = arith.constant dense<0.000000e+00> : vector<56x128xf32>
    %2 = tpu.matmul %0, %1, %cst {dimension_numbers = #tpu.dot_dimension_numbers<[1], [0], [0], [1], [0, 0, 1, 1], [], []>} : vector<56x10xbf16>, vector<10x128xbf16>, vector<56x128xf32> -> vector<56x128xf32>
    %c0_3 = arith.constant 0 : index
    %c0_4 = arith.constant 0 : index
    %3 = vector.load %arg2[%c0_3, %c0_4] : memref<1x128xf32, #tpu.memory_space<vmem>>, vector<1x128xf32>
    %4 = vector.broadcast %3 : vector<1x128xf32> to vector<56x128xf32>
    %5 = arith.addf %2, %4 : vector<56x128xf32>
    %6 = math.tanh %5 : vector<56x128xf32>
    %7 = arith.truncf %6 : vector<56x128xf32> to vector<56x128xbf16>
    %c0_5 = arith.constant 0 : index
    %c0_6 = arith.constant 0 : index
    %8 = vector.load %arg5[%c0_5, %c0_6] : memref<56x128xbf16, #tpu.memory_space<vmem>>, vector<56x128xbf16>
    tpu.vector_store %arg5[%c0_5, %c0_6], %7 {strides = array<i32>} : memref<56x128xbf16, #tpu.memory_space<vmem>>, vector<56x128xbf16>,
    %9 = arith.truncf %6 : vector<56x128xf32> to vector<56x128xbf16>
    %c0_7 = arith.constant 0 : index
    %c0_8 = arith.constant 0 : index
    %10 = vector.load %arg3[%c0_7, %c0_8] : memref<128x128xbf16, #tpu.memory_space<vmem>>, vector<128x128xbf16>
    %cst_9 = arith.constant dense<0.000000e+00> : vector<56x128xf32>
    %11 = tpu.matmul %9, %10, %cst_9 {dimension_numbers = #tpu.dot_dimension_numbers<[1], [0], [0], [1], [0, 0, 1, 1], [], []>} : vector<56x128xbf16>, vector<128x128xbf16>, vector<56x128xf32> -> vector<56x128xf32>
    %c0_10 = arith.constant 0 : index
    %c0_11 = arith.constant 0 : index
    %12 = vector.load %arg4[%c0_10, %c0_11] : memref<2x128xf32, #tpu.memory_space<vmem>>, vector<1x128xf32>
    %13 = vector.broadcast %12 : vector<1x128xf32> to vector<56x128xf32>
    %14 = arith.mulf %11, %13 : vector<56x128xf32>
    %cst_12 = arith.constant dense<0.000000e+00> : vector<56xf32>
    %15 = vector.multi_reduction <add>, %14, %cst_12 [1] : vector<56x128xf32> to vector<56xf32>
    %16 = vector.shape_cast %15 : vector<56xf32> to vector<56x1xf32>
    %c1 = arith.constant 1 : index
    %c0_13 = arith.constant 0 : index
    %17 = vector.load %arg4[%c1, %c0_13] : memref<2x128xf32, #tpu.memory_space<vmem>>, vector<1x128xf32>
    %18 = vector.broadcast %17 : vector<1x128xf32> to vector<56x128xf32>
    %19 = arith.mulf %11, %18 : vector<56x128xf32>
    %cst_14 = arith.constant dense<0.000000e+00> : vector<56xf32>
    %20 = vector.multi_reduction <add>, %19, %cst_14 [1] : vector<56x128xf32> to vector<56xf32>
    %21 = vector.shape_cast %20 : vector<56xf32> to vector<56x1xf32>
    %22 = tpu.iota {dimensions = array<i32: 1>} : vector<1x56xi32>
    %c50_i32 = arith.constant 50 : i32
    %23 = vector.broadcast %c50_i32 : i32 to vector<1x56xi32>
    %24 = arith.cmpi slt, %22, %23 : vector<1x56xi32>
    %25 = tpu.transpose %21, [1, 0] : vector<56x1xf32> -> vector<1x56xf32>
    %cst_15 = arith.constant -1.000000e+30 : f32
    %26 = vector.broadcast %cst_15 : f32 to vector<1x56xf32>
    %27 = arith.select %24, %25, %26 : vector<1x56xi1>, vector<1x56xf32>
    %28 = vector.broadcast %16 : vector<56x1xf32> to vector<56x56xf32>
    %29 = vector.broadcast %27 : vector<1x56xf32> to vector<56x56xf32>
    %30 = arith.addf %28, %29 : vector<56x56xf32>
    %cst_16 = arith.constant 0.000000e+00 : f32
    %31 = vector.broadcast %cst_16 : f32 to vector<56x56xf32>
    %32 = arith.cmpf ogt, %30, %31 : vector<56x56xf32>
    %cst_17 = arith.constant 2.000000e-01 : f32
    %33 = vector.broadcast %cst_17 : f32 to vector<56x56xf32>
    %34 = arith.mulf %33, %30 : vector<56x56xf32>
    %35 = arith.select %32, %30, %34 : vector<56x56xi1>, vector<56x56xf32>
    %cst_18 = arith.constant dense<0xFF800000> : vector<56xf32>
    %36 = vector.multi_reduction <maximumf>, %35, %cst_18 [1] : vector<56x56xf32> to vector<56xf32>
    %37 = vector.shape_cast %36 : vector<56xf32> to vector<56x1xf32>
    %38 = vector.broadcast %37 : vector<56x1xf32> to vector<56x56xf32>
    %39 = arith.subf %35, %38 : vector<56x56xf32>
    %40 = math.exp %39 : vector<56x56xf32>
    %cst_19 = arith.constant dense<0.000000e+00> : vector<56xf32>
    %41 = vector.multi_reduction <add>, %40, %cst_19 [1] : vector<56x56xf32> to vector<56xf32>
    %42 = vector.shape_cast %41 : vector<56xf32> to vector<56x1xf32>
    %43 = arith.truncf %40 : vector<56x56xf32> to vector<56x56xbf16>
    %44 = arith.truncf %11 : vector<56x128xf32> to vector<56x128xbf16>
    %cst_20 = arith.constant dense<0.000000e+00> : vector<56x128xf32>
    %45 = tpu.matmul %43, %44, %cst_20 {dimension_numbers = #tpu.dot_dimension_numbers<[1], [0], [0], [1], [0, 0, 1, 1], [], []>} : vector<56x56xbf16>, vector<56x128xbf16>, vector<56x128xf32> -> vector<56x128xf32>
    %46 = tpu.reciprocal %42 {approx = true} : vector<56x1xf32> -> vector<56x1xf32>
    %47 = vector.broadcast %46 : vector<56x1xf32> to vector<56x128xf32>
    %48 = arith.mulf %45, %47 : vector<56x128xf32>
    %c0_21 = arith.constant 0 : index
    %c0_22 = arith.constant 0 : index
    %49 = vector.load %arg6[%c0_21, %c0_22] : memref<56x128xf32, #tpu.memory_space<vmem>>, vector<56x128xf32>
    tpu.vector_store %arg6[%c0_21, %c0_22], %48 {strides = array<i32>} : memref<56x128xf32, #tpu.memory_space<vmem>>, vector<56x128xf32>,
    return
  }
}

</mosaic_0001>

<bundles_post_ra>
// kernel: tpu_custom_call.1
= control target key start
LH: loop header
LB: loop body
LE: loop exit
PB: predicated region body
PF: predicated region fallthrough
CT: control target
= control target key end

     0   :  { %12 = vsyncpa [#allocation3], 0  ;;  %s871_s0 = inlined_call_operand.vmem [shape: bf16[56,10], index: 0, kind: input, shape index: {}]   ;;  %s872_s1 = inlined_call_operand.vmem [shape: bf16[10,128], index: 1, kind: input, shape index: {}]   ;;  %s873_s2 = inlined_call_operand.vmem [shape: f32[1,128], index: 2, kind: input, shape index: {}]   ;;  %s874_s3 = inlined_call_operand.hbm [shape: bf16[128,128], index: 3, kind: input, shape index: {}]   ;;  %s875_s4 = inlined_call_operand.vmem [shape: f32[2,128], index: 4, kind: input, shape index: {}]   ;;  %s876_s5 = inlined_call_operand.hbm [shape: bf16[56,128], index: 5, kind: output, shape index: {0}]   ;;  %s877_s6 = inlined_call_operand.hbm [shape: f32[56,128], index: 6, kind: output, shape index: {1}]  }
   0x1   :  { %13 = vsyncpa [#allocation4], 0 }
   0x2   :  { %14 = vsyncpa [#allocation7], 0  ;;  %s25_s23 = sshll.u32 %s874_s3, 4  ;;  %s766_s24 = smov [#allocation2]   ;;  %s26_s23 = int_to_ptr.hbm [resolvable:$true] %s25_s23 }
   0x3   :  { %s27_s25 = sshll.u32 %s766_s24, 4  ;;  %s767_s26 = smov 64   ;;  %s28_s25 = int_to_ptr.vmem [resolvable:$true] %s27_s25 }
   0x4   :  { %s768_s27 = smov 4  }
   0x5   :  { %33 = dma.hbm_to_vmem [thread:$0]  %s26_s23, 1024, %s28_s25, [#allocation3], %s767_s26, %s767_s26, %s768_s27  }
   0x6   :  { %760 = dma.done.wait [#allocation3], 1024  }
   0x7   :  { %761 = vsyncadd [#allocation3], 4294966272  ;;  %v556_v0 = vld [vmem:[%s872_s1] sm:$0xf]  ;;  %v601_v1 = vld [vmem:[%s872_s1] sm:$0x10] }
   0x8   :  { %vm90_vm0 = vcmask 1044480   ;;  %v557_v2 = vor.u32 %v601_v1, %v556_v0  ;;  %v598_v4 = vld [vmem:[%s871_s0] sm:$0xff]  ;;  %vm77_vm1 = vcmask 80896   ;;  %v599_v5 = vld [vmem:[%s871_s0 + $0x8] sm:$0xff]  ;;  %v609_v6 = vld [vmem:[#allocation2 + $0x38] sm:$0xff]  ;;  %vm452_vm2 = vcmask 1043456  }
   0x9   :  { %229 = vmatpush.bf16.msra.mxu1 %v609_v6  ;;  %v608_v7 = vld [vmem:[#allocation2 + $0x30] sm:$0xff]  ;;  %627 = vmatpush.bf16.msra.mxu3 %v609_v6  ;;  %v47_v9 = vld [vmem:[%s871_s0 + $0x18] sm:$0xf]  ;;  %v607_v12 = vld [vmem:[#allocation2 + $0x28] sm:$0xff]  ;;  %vm368_vm4 = vcmask 457728   ;;  %s511_s19 = sshll.u32 %s876_s5, 4  ;;  %s512_s19 = int_to_ptr.hbm [resolvable:$true] %s511_s19 }
   0xa   :  { %v92_v3 = vsel %vm90_vm0, %v557_v2, 0  ;;  %v600_v8 = vld [vmem:[%s871_s0 + $0x10] sm:$0xff]  ;;  %v67_v10 = vunpack.c.l.b16 %v47_v9  ;;  %v606_v13 = vld [vmem:[#allocation2 + $0x20] sm:$0xff]  ;;  %v605_v14 = vld [vmem:[#allocation2 + $0x18] sm:$0xff]  ;;  %s769_s20 = smov [#allocation5]   ;;  %s770_s5 = smov [#allocation6]  }
   0xb   :  { %101 = vmatpush.bf16.msra.mxu0 %v92_v3  ;;  %v604_v15 = vld [vmem:[#allocation2 + $0x10] sm:$0xff]  ;;  %v603_v16 = vld [vmem:[#allocation2 + $0x8] sm:$0xff]  ;;  %v602_v17 = vld [vmem:[#allocation2] sm:$0xff]  ;;  %s509_s21 = sshll.u32 %s769_s20, 4  ;;  %s522_s22 = sshll.u32 %s770_s5, 4  ;;  %s510_s21 = int_to_ptr.vmem [resolvable:$true] %s509_s21  ;;  %s523_s22 = int_to_ptr.vmem [resolvable:$true] %s522_s22 }
   0xc   :  { %v71_v11 = vpack.c.b16 %v67_v10, %v67_v10  ;;  %v643_v18 = vld [vmem:[%s873_s2] ss:$0 sm:$0xff]  ;;  %v644_v62 = vld [vmem:[%s875_s4 + $0x1] ss:$0 sm:$0xff]  ;;  %s524_s25 = sshll.u32 %s877_s6, 4  ;;  %s525_s25 = int_to_ptr.hbm [resolvable:$true] %s524_s25 }
   0xd   :  { %230 = vmatpush.bf16.msra.mxu1 %v608_v7  ;;  %628 = vmatpush.bf16.msra.mxu3 %v608_v7  ;;  %v645_v7 = vld [vmem:[%s875_s4] ss:$0 sm:$0xff] }
   0xe   :  { %558 = vmatmul.msk.bf16.vlgmr.msra.gmra.mxu0 %vm77_vm1, %v598_v4 }
  0x11   :  { %231 = vmatpush.bf16.msra.mxu1 %v607_v12  ;;  %629 = vmatpush.bf16.msra.mxu3 %v607_v12 }
  0x15   :  { %232 = vmatpush.bf16.msra.mxu1 %v606_v13  ;;  %630 = vmatpush.bf16.msra.mxu3 %v606_v13 }
  0x19   :  { %233 = vmatpush.bf16.msra.mxu1 %v605_v14  ;;  %631 = vmatpush.bf16.msra.mxu3 %v605_v14 }
  0x1d   :  { %234 = vmatpush.bf16.msra.mxu1 %v604_v15  ;;  %632 = vmatpush.bf16.msra.mxu3 %v604_v15 }
  0x1e   :  { %559 = vmatmul.msk.bf16.gmra.mxu0 %vm77_vm1, %v599_v5 }
  0x21   :  { %235 = vmatpush.bf16.msra.mxu1 %v603_v16  ;;  %633 = vmatpush.bf16.msra.mxu3 %v603_v16 }
  0x25   :  { %236 = vmatpush.bf16.msra.mxu1 %v602_v17  ;;  %634 = vmatpush.bf16.msra.mxu3 %v602_v17 }
  0x2e   :  { %560 = vmatmul.msk.bf16.gmra.mxu0 %vm77_vm1, %v600_v8 }
  0x3e   :  { %561 = vmatmul.msk.bf16.gmra.mxu0 %vm77_vm1, %v71_v11 }
  0x8b   :  { %v103_v19 = vpop.f32.mrf.mxu0 }
  0x8c   :  { %v104_v20 = vadd.f32 %v643_v18, %v103_v19 }
  0x8e   :  { %646 = vtanh.f32 %v104_v20 }
  0x93   :  { %v105_v21 = vpop.f32.mrf.mxu0 }
  0x94   :  { %v106_v22 = vadd.f32 %v643_v18, %v105_v21  ;;  %v647_v23 = vpop.eup %646 }
  0x95   :  { %v129_v25 = vpack.c.bf16 %v647_v23, %v647_v23 }
  0x96   :  { %648 = vtanh.f32 %v106_v22 }
  0x97   :  { %v166_v30 = vunpack.c.l.b16 %v129_v25 }
  0x9b   :  { %v108_v24 = vpop.f32.mrf.mxu0 }
  0x9c   :  { %v649_v26 = vpop.eup %648  ;;  %v109_v29 = vadd.f32 %v643_v18, %v108_v24 }
  0x9d   :  { %v613_v27 = vpack.c.bf16 %v649_v26, %v647_v23  ;;  %v130_v28 = vpack.c.bf16 %v649_v26, %v649_v26 }
  0x9e   :  { %650 = vtanh.f32 %v109_v29 }
  0x9f   :  { %614 = vst [vmem:[#allocation5] sm:$0xff] %v613_v27   ;;  %v167_v31 = vunpack.c.l.b16 %v130_v28 }
  0xa1   :  { %v173_v32 = vpack.c.b16 %v167_v31, %v166_v30 }
  0xa3   :  { %v110_v33 = vpop.f32.mrf.mxu0  ;;  %237 = vmatmul.bf16.vlgmr.msra.gmra.mxu1 %v173_v32 }
  0xa4   :  { %v111_v34 = vadd.f32 %v643_v18, %v110_v33  ;;  %v651_v35 = vpop.eup %650 }
  0xa5   :  { %v131_v37 = vpack.c.bf16 %v651_v35, %v651_v35 }
  0xa6   :  { %652 = vtanh.f32 %v111_v34  ;;  %v303_v34 = vlaneseq }
  0xa7   :  { %v168_v42 = vunpack.c.l.b16 %v131_v37 }
  0xab   :  { %v113_v36 = vpop.f32.mrf.mxu0 }
  0xac   :  { %v653_v38 = vpop.eup %652  ;;  %v114_v41 = vadd.f32 %v643_v18, %v113_v36  ;;  %v304_v36 = vand.u32 127, %v303_v34 }
  0xad   :  { %v618_v39 = vpack.c.bf16 %v653_v38, %v651_v35  ;;  %v132_v40 = vpack.c.bf16 %v653_v38, %v653_v38 }
  0xae   :  { %654 = vtanh.f32 %v114_v41  ;;  %vm305_vm3 = vcmp.lt.s32.totalorder %v304_v36, 50 }
  0xaf   :  { %625 = vst [vmem:[#allocation5 + $0x8] sm:$0xff] %v618_v39   ;;  %v169_v43 = vunpack.c.l.b16 %v132_v40 }
  0xb1   :  { %v174_v44 = vpack.c.b16 %v169_v43, %v168_v42 }
  0xb3   :  { %v115_v45 = vpop.f32.mrf.mxu0  ;;  %242 = vmatmul.bf16.vlgmr.msra.gmra.mxu3 %v174_v44 }
  0xb4   :  { %v116_v46 = vadd.f32 %v643_v18, %v115_v45  ;;  %v655_v47 = vpop.eup %654 }
  0xb5   :  { %v133_v49 = vpack.c.bf16 %v655_v47, %v655_v47 }
  0xb6   :  { %656 = vtanh.f32 %v116_v46 }
  0xb7   :  { %v170_v54 = vunpack.c.l.b16 %v133_v49 }
  0xbb   :  { %v118_v48 = vpop.f32.mrf.mxu0 }
  0xbc   :  { %v657_v50 = vpop.eup %656  ;;  %v119_v51 = vadd.f32 %v643_v18, %v118_v48 }
  0xbd   :  { %v623_v52 = vpack.c.bf16 %v657_v50, %v655_v47  ;;  %v134_v53 = vpack.c.bf16 %v657_v50, %v657_v50 }
  0xbe   :  { %658 = vtanh.f32 %v119_v51 }
  0xbf   :  { %626 = vst [vmem:[#allocation5 + $0x10] sm:$0xff] %v623_v52   ;;  %v171_v55 = vunpack.c.l.b16 %v134_v53 }
  0xc1   :  { %v175_v56 = vpack.c.b16 %v171_v55, %v170_v54 }
  0xc3   :  { %v120_v57 = vpop.f32.mrf.mxu0  ;;  %247 = vmatmul.bf16.gmra.mxu3 %v175_v56 }
  0xc4   :  { %v659_v58 = vpop.eup %658 }
  0xc5   :  { %v135_v59 = vpack.c.bf16 %v659_v58, %v659_v58 }
  0xc7   :  { %142 = vst [vmem:[#allocation5 + $0x18] sm:$0xf] %v135_v59  ;;  %v172_v60 = vunpack.c.l.b16 %v135_v59 }
  0xc8   :  { %517 = dma.vmem_to_hbm [thread:$0]  %s510_s21, 448, %s512_s19, [#allocation4], %s767_s26, %s767_s26, %s768_s27  }
  0xc9   :  { %v176_v61 = vpack.c.b16 %v172_v60, %v172_v60  ;;  %s771_s26 = smov 128   ;;  %s772_s27 = smov 8  }
  0xd3   :  { %252 = vmatmul.bf16.gmra.mxu3 %v176_v61 }
 0x120   :  { %v238_v63 = vpop.f32.mrf.mxu1 }
 0x121   :  { %v282_v0 = vmul.f32 %v644_v62, %v238_v63  ;;  %v259_v10 = vmul.f32 %v645_v7, %v238_v63 }
 0x123   :  { %289 = vadd.xlane.f32.xlu0 %v282_v0 }
 0x128   :  { %v240_v1 = vpop.f32.mrf.mxu1 }
 0x129   :  { %v283_v2 = vmul.f32 %v644_v62, %v240_v1  ;;  %v260_v19 = vmul.f32 %v645_v7, %v240_v1  ;;  %v436_v25 = vpack.c.bf16 %v240_v1, %v238_v63 }
 0x12b   :  { %291 = vadd.xlane.f32.xlu0 %v283_v2 }
 0x136   :  { %v243_v3 = vpop.f32.mrf.mxu3 }
 0x137   :  { %v284_v4 = vmul.f32 %v644_v62, %v243_v3  ;;  %v261_v23 = vmul.f32 %v645_v7, %v243_v3 }
 0x139   :  { %293 = vadd.xlane.f32.xlu1 %v284_v4 }
 0x13e   :  { %v245_v5 = vpop.f32.mrf.mxu3 }
 0x13f   :  { %v285_v6 = vmul.f32 %v644_v62, %v245_v5  ;;  %v262_v13 = vmul.f32 %v645_v7, %v245_v5  ;;  %v437_v24 = vpack.c.bf16 %v245_v5, %v243_v3 }
 0x141   :  { %295 = vadd.xlane.f32.xlu1 %v285_v6 }
 0x146   :  { %v248_v8 = vpop.f32.mrf.mxu3 }
 0x147   :  { %v286_v9 = vmul.f32 %v644_v62, %v248_v8  ;;  %v263_v26 = vmul.f32 %v645_v7, %v248_v8 }
 0x149   :  { %297 = vadd.xlane.f32.xlu2 %v286_v9  ;;  %266 = vadd.xlane.f32.xlu1 %v259_v10 }
 0x14e   :  { %v250_v11 = vpop.f32.mrf.mxu3 }
 0x14f   :  { %v287_v12 = vmul.f32 %v644_v62, %v250_v11  ;;  %v264_v15 = vmul.f32 %v645_v7, %v250_v11  ;;  %v438_v21 = vpack.c.bf16 %v250_v11, %v248_v8 }
 0x151   :  { %299 = vadd.xlane.f32.xlu2 %v287_v12  ;;  %272 = vadd.xlane.f32.xlu1 %v262_v13 }
 0x156   :  { %v253_v14 = vpop.f32.mrf.mxu3 }
 0x157   :  { %v288_v16 = vmul.f32 %v644_v62, %v253_v14  ;;  %v439_v17 = vpack.c.bf16 %v253_v14, %v253_v14  ;;  %v841_v18 = vmul.f32 %v645_v7, %v253_v14 }
 0x159   :  { %276 = vadd.xlane.f32.xlu1 %v264_v15  ;;  %301 = vadd.xlane.f32.xlu0 %v288_v16  ;;  %v454_v20 = vsel %vm452_vm2, %v439_v17, 0 }
 0x15a   :  { %268 = vadd.xlane.f32.xlu2 %v260_v19  ;;  %460 = vmatpush.bf16.msra.mxu2 %v454_v20 }
 0x15e   :  { %v255_v22 = vpop.f32.mrf.mxu3  ;;  %461 = vmatpush.bf16.msra.mxu2 %v438_v21 }
 0x161   :  { %270 = vadd.xlane.f32.xlu0 %v261_v23 }
 0x162   :  { %462 = vmatpush.bf16.msra.mxu2 %v437_v24 }
 0x166   :  { %463 = vmatpush.bf16.msra.mxu2 %v436_v25 }
 0x169   :  { %274 = vadd.xlane.f32.xlu0 %v263_v26 }
 0x196   :  { %v290_v27 = vpop.xlane.xlu0 %289 }
 0x197   :  { %306 = vxpose.xlu2.b32.start [1/7] (short) (narrow) %v290_v27, 8 }
 0x19e   :  { %v292_v28 = vpop.xlane.xlu0 %291 }
 0x19f   :  { %307 = vxpose.xlu2.b32.cont [2/7] (short) (narrow) %v292_v28, 8 }
 0x1ac   :  { %v294_v29 = vpop.xlane.xlu1 %293 }
 0x1ad   :  { %308 = vxpose.xlu2.b32.cont [3/7] (short) (narrow) %v294_v29, 8 }
 0x1b4   :  { %v296_v30 = vpop.xlane.xlu1 %295 }
 0x1b5   :  { %309 = vxpose.xlu2.b32.cont [4/7] (short) (narrow) %v296_v30, 8 }
 0x1bc   :  { %v298_v31 = vpop.xlane.xlu2 %297  ;;  %v267_v38 = vpop.xlane.xlu1 %266 }
 0x1bd   :  { %310 = vxpose.xlu2.b32.cont [5/7] (short) (narrow) %v298_v31, 8 }
 0x1c4   :  { %v300_v32 = vpop.xlane.xlu2 %299  ;;  %v273_v52 = vpop.xlane.xlu1 %272 }
 0x1c5   :  { %311 = vxpose.xlu2.b32.cont [6/7] (short) (narrow) %v300_v32, 8 }
 0x1cc   :  { %v302_v33 = vpop.xlane.xlu0 %301  ;;  %v277_v60 = vpop.xlane.xlu1 %276 }
 0x1cd   :  { %312 = vxpose.xlu2.b32.end [7/7] (short) (narrow) %v302_v33, 8  ;;  %v269_v35 = vpop.xlane.xlu2 %268 }
 0x1d4   :  { %v271_v41 = vpop.xlane.xlu0 %270 }
 0x1dc   :  { %v275_v53 = vpop.xlane.xlu0 %274 }
 0x236   :  { %v322_v37 = vpop.trf.xlu2 }
 0x237   :  { %v338_v39 = vsel %vm305_vm3, %v322_v37, -1e+30 }
 0x238   :  { %v339_v40 = vperm.slane %v338_v39, 0 }
 0x23a   :  { %v341_v42 = vadd.f32 %v339_v40, %v269_v35  ;;  %v340_v43 = vadd.f32 %v339_v40, %v267_v38  ;;  %v342_v44 = vadd.f32 %v339_v40, %v271_v41  ;;  %v344_v55 = vadd.f32 %v339_v40, %v275_v53 }
 0x23b   :  { %v343_v56 = vadd.f32 %v339_v40, %v273_v52  ;;  %v345_v63 = vadd.f32 %v339_v40, %v277_v60 }
 0x23c   :  { %vm348_vm5 = vcmp.gt.f32.partialorder %v341_v42, 0.0  ;;  %v355_v45 = vmul.f32 0.2, %v341_v42  ;;  %vm347_vm6 = vcmp.gt.f32.partialorder %v340_v43, 0.0  ;;  %v354_v46 = vmul.f32 0.2, %v340_v43 }
 0x23d   :  { %v356_v51 = vmul.f32 0.2, %v342_v44  ;;  %vm349_vm7 = vcmp.gt.f32.partialorder %v342_v44, 0.0  ;;  %v358_v58 = vmul.f32 0.2, %v344_v55  ;;  %vm351_vm8 = vcmp.gt.f32.partialorder %v344_v55, 0.0 }
 0x23e   :  { %v362_v47 = vsel %vm348_vm5, %v341_v42, %v355_v45  ;;  %v361_v48 = vsel %vm347_vm6, %v340_v43, %v354_v46  ;;  %v357_v59 = vmul.f32 0.2, %v343_v56  ;;  %vm350_vm9 = vcmp.gt.f32.partialorder %v343_v56, 0.0 }
 0x23f   :  { %v372_v49 = vsel %vm368_vm4, %v362_v47, -inf  ;;  %v369_v50 = vsel %vm368_vm4, %v361_v48, -inf  ;;  %v363_v54 = vsel %vm349_vm7, %v342_v44, %v356_v51  ;;  %v365_v61 = vsel %vm351_vm8, %v344_v55, %v358_v58 }
 0x240   :  { %373 = vmax.xlane.f32.xlu1 %v372_v49  ;;  %370 = vmax.xlane.f32.xlu0 %v369_v50  ;;  %v375_v57 = vsel %vm368_vm4, %v363_v54, -inf  ;;  %v364_v62 = vsel %vm350_vm9, %v343_v56, %v357_v59  ;;  %v381_v0 = vsel %vm368_vm4, %v365_v61, -inf  ;;  %v359_v2 = vmul.f32 0.2, %v345_v63 }
 0x241   :  { %v378_v1 = vsel %vm368_vm4, %v364_v62, -inf  ;;  %vm352_vm10 = vcmp.gt.f32.partialorder %v345_v63, 0.0 }
 0x242   :  { %v366_v3 = vsel %vm352_vm10, %v345_v63, %v359_v2 }
 0x243   :  { %v384_v4 = vsel %vm368_vm4, %v366_v3, -inf }
 0x248   :  { %376 = vmax.xlane.f32.xlu1 %v375_v57  ;;  %278 = vadd.xlane.f32.xlu0 %v841_v18 }
 0x250   :  { %382 = vmax.xlane.f32.xlu1 %v381_v0  ;;  %379 = vmax.xlane.f32.xlu0 %v378_v1 }
 0x258   :  { %385 = vmax.xlane.f32.xlu0 %v384_v4 }
 0x2b3   :  { %v374_v5 = vpop.xlane.xlu1 %373  ;;  %v371_v6 = vpop.xlane.xlu0 %370 }
 0x2b4   :  { %v391_v7 = vsub.f32 %v362_v47, %v374_v5  ;;  %v390_v8 = vsub.f32 %v361_v48, %v371_v6 }
 0x2b6   :  { %v399_v9 = vmul.f32 1.442695, %v391_v7  ;;  %v397_v10 = vmul.f32 1.442695, %v390_v8 }
 0x2b8   :  { %660 = vpow2.f32 %v399_v9 }
 0x2b9   :  { %662 = vpow2.f32 %v397_v10 }
 0x2bb   :  { %v377_v11 = vpop.xlane.xlu1 %376  ;;  %v279_v12 = vpop.xlane.xlu0 %278 }
 0x2bc   :  { %v392_v13 = vsub.f32 %v363_v54, %v377_v11  ;;  %v346_v14 = vadd.f32 %v339_v40, %v279_v12 }
 0x2be   :  { %v661_v15 = vpop.eup %660  ;;  %v401_v16 = vmul.f32 1.442695, %v392_v13  ;;  %v360_v17 = vmul.f32 0.2, %v346_v14  ;;  %vm353_vm11 = vcmp.gt.f32.partialorder %v346_v14, 0.0 }
 0x2bf   :  { %v663_v18 = vpop.eup %662  ;;  %v414_v31 = vsel %vm368_vm4, %v661_v15, 0.0 }
 0x2c0   :  { %664 = vpow2.f32 %v401_v16  ;;  %v411_v19 = vsel %vm368_vm4, %v663_v18, 0.0  ;;  %v432_v20 = vpack.c.bf16 %v661_v15, %v663_v18  ;;  %v367_v21 = vsel %vm353_vm11, %v346_v14, %v360_v17 }
 0x2c1   :  { %412 = vadd.xlane.f32.xlu0 %v411_v19  ;;  %v387_v22 = vsel %vm368_vm4, %v367_v21, -inf }
 0x2c2   :  { %594 = vmatmul.msk.bf16.vlgmr.msra.gmra.mxu2 %vm368_vm4, %v432_v20  ;;  %388 = vmax.xlane.f32.xlu1 %v387_v22 }
 0x2c3   :  { %v383_v23 = vpop.xlane.xlu1 %382  ;;  %v380_v24 = vpop.xlane.xlu0 %379 }
 0x2c4   :  { %v394_v25 = vsub.f32 %v365_v61, %v383_v23  ;;  %v393_v26 = vsub.f32 %v364_v62, %v380_v24 }
 0x2c6   :  { %v665_v27 = vpop.eup %664  ;;  %v405_v28 = vmul.f32 1.442695, %v394_v25  ;;  %v403_v29 = vmul.f32 1.442695, %v393_v26 }
 0x2c7   :  { %v417_v30 = vsel %vm368_vm4, %v665_v27, 0.0 }
 0x2c8   :  { %666 = vpow2.f32 %v405_v28 }
 0x2c9   :  { %668 = vpow2.f32 %v403_v29  ;;  %418 = vadd.xlane.f32.xlu0 %v417_v30 }
 0x2ca   :  { %415 = vadd.xlane.f32.xlu1 %v414_v31 }
 0x2cb   :  { %v386_v32 = vpop.xlane.xlu0 %385 }
 0x2cc   :  { %v395_v33 = vsub.f32 %v366_v3, %v386_v32 }
 0x2ce   :  { %v667_v34 = vpop.eup %666  ;;  %v407_v35 = vmul.f32 1.442695, %v395_v33 }
 0x2cf   :  { %v669_v36 = vpop.eup %668  ;;  %v423_v37 = vsel %vm368_vm4, %v667_v34, 0.0 }
 0x2d0   :  { %670 = vpow2.f32 %v407_v35  ;;  %v433_v38 = vpack.c.bf16 %v669_v36, %v665_v27  ;;  %v420_v39 = vsel %vm368_vm4, %v669_v36, 0.0 }
 0x2d1   :  { %424 = vadd.xlane.f32.xlu0 %v423_v37 }
 0x2d2   :  { %595 = vmatmul.msk.bf16.gmra.mxu2 %vm368_vm4, %v433_v38  ;;  %421 = vadd.xlane.f32.xlu1 %v420_v39 }
 0x2d6   :  { %v671_v40 = vpop.eup %670 }
 0x2d7   :  { %v426_v41 = vsel %vm368_vm4, %v671_v40, 0.0  ;;  %v434_v42 = vpack.c.bf16 %v671_v40, %v667_v34 }
 0x2da   :  { %427 = vadd.xlane.f32.xlu1 %v426_v41 }
 0x2e2   :  { %596 = vmatmul.msk.bf16.gmra.mxu2 %vm368_vm4, %v434_v42 }
 0x334   :  { %v413_v46 = vpop.xlane.xlu0 %412 }
 0x335   :  { %v389_v43 = vpop.xlane.xlu1 %388 }
 0x336   :  { %v396_v44 = vsub.f32 %v367_v21, %v389_v43 }
 0x338   :  { %v409_v45 = vmul.f32 1.442695, %v396_v44 }
 0x33a   :  { %672 = vpow2.f32 %v409_v45 }
 0x33b   :  { %674 = vrcp.f32 %v413_v46 }
 0x33c   :  { %v419_v54 = vpop.xlane.xlu0 %418 }
 0x33d   :  { %v416_v50 = vpop.xlane.xlu1 %415 }
 0x33e   :  { %676 = vrcp.f32 %v416_v50 }
 0x33f   :  { %678 = vrcp.f32 %v419_v54 }
 0x340   :  { %v673_v47 = vpop.eup %672 }
 0x341   :  { %v429_v48 = vsel %vm368_vm4, %v673_v47, 0.0  ;;  %v435_v49 = vpack.c.bf16 %v673_v47, %v673_v47  ;;  %v675_v51 = vpop.eup %674 }
 0x342   :  { %430 = vadd.xlane.f32.xlu0 %v429_v48 }
 0x343   :  { %597 = vmatmul.msk.bf16.gmra.mxu2 %vm368_vm4, %v435_v49 }
 0x344   :  { %v677_v55 = vpop.eup %676  ;;  %v425_v62 = vpop.xlane.xlu0 %424 }
 0x345   :  { %v465_v52 = vpop.f32.mrf.mxu2  ;;  %v422_v58 = vpop.xlane.xlu1 %421 }
 0x346   :  { %v491_v53 = vmul.f32 %v675_v51, %v465_v52  ;;  %v679_v59 = vpop.eup %678  ;;  %680 = vrcp.f32 %v422_v58 }
 0x347   :  { %682 = vrcp.f32 %v425_v62 }
 0x348   :  { %498 = vst [vmem:[#allocation6] sm:$0xff] %v491_v53 }
 0x34c   :  { %v681_v63 = vpop.eup %680 }
 0x34d   :  { %v467_v56 = vpop.f32.mrf.mxu2  ;;  %v428_v2 = vpop.xlane.xlu1 %427 }
 0x34e   :  { %v492_v57 = vmul.f32 %v677_v55, %v467_v56  ;;  %v683_v3 = vpop.eup %682  ;;  %684 = vrcp.f32 %v428_v2 }
 0x350   :  { %499 = vst [vmem:[#allocation6 + $0x8] sm:$0xff] %v492_v57 }
 0x354   :  { %v685_v6 = vpop.eup %684 }
 0x355   :  { %v470_v60 = vpop.f32.mrf.mxu2 }
 0x356   :  { %v493_v61 = vmul.f32 %v679_v59, %v470_v60 }
 0x358   :  { %500 = vst [vmem:[#allocation6 + $0x10] sm:$0xff] %v493_v61 }
 0x35d   :  { %v472_v0 = vpop.f32.mrf.mxu2 }
 0x35e   :  { %v494_v1 = vmul.f32 %v681_v63, %v472_v0 }
 0x360   :  { %501 = vst [vmem:[#allocation6 + $0x18] sm:$0xff] %v494_v1 }
 0x365   :  { %v475_v4 = vpop.f32.mrf.mxu2 }
 0x366   :  { %v495_v5 = vmul.f32 %v683_v3, %v475_v4 }
 0x368   :  { %502 = vst [vmem:[#allocation6 + $0x20] sm:$0xff] %v495_v5 }
 0x36d   :  { %v477_v7 = vpop.f32.mrf.mxu2 }
 0x36e   :  { %v496_v8 = vmul.f32 %v685_v6, %v477_v7 }
 0x370   :  { %503 = vst [vmem:[#allocation6 + $0x28] sm:$0xff] %v496_v8 }
 0x3b5   :  { %v431_v9 = vpop.xlane.xlu0 %430 }
 0x3b6   :  { %686 = vrcp.f32 %v431_v9 }
 0x3bc   :  { %v687_v10 = vpop.eup %686 }
 0x3c6   :  { %v480_v11 = vpop.f32.mrf.mxu2 }
 0x3c7   :  { %v497_v12 = vmul.f32 %v687_v10, %v480_v11 }
 0x3c9   :  { %504 = vst [vmem:[#allocation6 + $0x30] sm:$0xff] %v497_v12 }
 0x3ca   :  { %530 = dma.vmem_to_hbm [thread:$0]  %s523_s22, 896, %s525_s25, [#allocation7], %s771_s26, %s771_s26, %s772_s27  }
 0x3ce   :  { %v482_v13 = vpop.f32.mrf.mxu2 }
 0x3cf   :  { %762 = dma.done.wait [#allocation4], 448  }
 0x3d0   :  { %763 = vsyncadd [#allocation4], 4294966848 }
 0x3d1   :  { %764 = dma.done.wait [#allocation7], 896  }
 0x3d2   :  { %765 = vsyncadd [#allocation7], 4294966400 }
 0x3d3   :  { %539 = vsyncpa [#allocation3], 1 }
 0x3d4   :  { %540 = vsyncpa [#allocation4], 1 }
 0x3d5   :  { %541 = vsyncpa [#allocation7], 1 }

</bundles_post_ra>
